<compile_context>
chip_gen: v7x
topology: tpu7x:2x2x1
jax: 0.10.0
libtpu: 0.0.40
codegen_flags: <defaults>
</compile_context>

<pallas_src>
import math

import jax
import jax.numpy as jnp
from jax.experimental import pallas as pl
from jax.experimental.pallas import tpu as pltpu


def _round_up(x, m):
    return (x + m - 1) // m * m


def _default_tile_sizes():
    """Generation-aware tile defaults.

    With the resident-x-slab design, arithmetic intensity ~= tm FLOP per
    weight byte: tm=512 saturates v5e/v7x, tm~=1024 is needed on v6e (highest
    FLOPs:BW ratio)."""
    try:
        kind = jax.devices()[0].device_kind.lower()
    except Exception:  # pragma: no cover - defensive
        kind = ""
    if "v6" in kind:
        return 1024, 512, 1024  # tm, tn, tk
    return 512, 512, 1024


def _pick_tk(Kp, tk_max):
    """Largest multiple of 128 <= tk_max that divides Kp.

    The K grid must cover the zero-padded contraction exactly (K padding feeds
    the reduction, so masked/garbage K blocks are not allowed)."""
    tk_max = max(128, min(int(tk_max), Kp))
    tk_max = (tk_max // 128) * 128
    for t in range(tk_max, 127, -128):
        if Kp % t == 0:
            return t
    return Kp  # Kp not a multiple of 128: fall back to a single full block.


def _vmem_bytes(tm, tn, tk, Kp, Rp):
    """Rough live-VMEM estimate (inputs/outputs double-buffered + scratch)."""
    x_slab = tm * Kp * 2
    w1 = Kp * Rp * 2
    bw = tk * tn * 2
    w2 = Rp * tn * 2
    out = tm * tn * 2
    acc = tm * tn * 4
    h16 = tm * Rp * 2
    return 2 * (x_slab + w1 + bw + w2 + out) + acc + h16


def prepare_lora_weights(base_weight, lora_w1, lora_w2, *, tk=1024):
    """One-time (load-time) weight preparation.

    base_weight : (N, K) frozen weight (PyTorch (out, in) layout)
    lora_w1     : (R, K)
    lora_w2     : (N, R)

    Returns lane-dense transposed weights bwT (Kp, N), w1T (Kp, Rp), w2T (Rp, N)
    where Kp = K zero-padded to a tile multiple (reduction padding MUST be
    zeros) and Rp = LoRA rank padded to one full 128-lane vreg.  N is left
    unpadded; ragged N edges are handled by masked edge blocks in the kernel.
    """
    N, K = base_weight.shape
    R, K1 = lora_w1.shape
    N2, R2 = lora_w2.shape
    assert K1 == K and N2 == N and R2 == R

    tk = max(128, (int(tk) // 128) * 128)
    tk_eff = min(tk, _round_up(K, 128))
    Kp = _round_up(K, tk_eff)
    Rp = _round_up(max(R, 128), 128)

    bwT = jnp.zeros((Kp, N), base_weight.dtype).at[:K, :].set(base_weight.T)
    w1T = jnp.zeros((Kp, Rp), lora_w1.dtype).at[:K, :R].set(lora_w1.T)
    w2T = jnp.zeros((Rp, N), lora_w2.dtype).at[:R, :].set(lora_w2.T)
    return bwT, w1T, w2T


def lora_optimized_linear(x, bwT, w1T, w2T, lora_alpha, lora_r,
                          *, tm=None, tn=None, tk=None, vmem_limit_bytes=None):
    """Forward pass.

    x            : (..., input_dim) bf16
    bwT/w1T/w2T  : outputs of prepare_lora_weights (pre-transposed + padded)
    Returns (..., output_dim) in x.dtype.
    """
    orig_shape = x.shape
    K = orig_shape[-1]
    Kp, N = bwT.shape
    Rp = w1T.shape[1]
    assert w1T.shape[0] == Kp and w2T.shape == (Rp, N)
    assert K <= Kp

    x2d = x.reshape(-1, K)
    M = x2d.shape[0]
    if Kp != K:
        # Zero-pad only the contraction dim (it feeds the reduction, so the
        # padding must be real zeros).  M/N padding is handled by masked edge
        # blocks instead of a host-side copy.
        x2d = jnp.pad(x2d, ((0, 0), (0, Kp - K)))

    dm, dn, dk = _default_tile_sizes()
    tm = dm if tm is None else tm
    tn = dn if tn is None else tn
    tk = dk if tk is None else tk

    tm = min(tm, _round_up(M, 8))      # multiple of 8 (sublane rule)
    tn = min(tn, N)                    # == N when N < default (always legal)
    tk = _pick_tk(Kp, tk)              # divisor of Kp, multiple of 128

    # Fit the VMEM budget (leave pipelining headroom on v7x's 64 MiB).
    budget = 48 * (1 << 20)
    while _vmem_bytes(tm, tn, tk, Kp, Rp) > budget and tm > 256:
        tm = max(256, tm // 2)
    while _vmem_bytes(tm, tn, tk, Kp, Rp) > budget and tn > 256:
        tn = max(256, tn // 2)

    nk = Kp // tk
    grid = (pl.cdiv(M, tm), pl.cdiv(N, tn), nk)

    if vmem_limit_bytes is None:
        est = _vmem_bytes(tm, tn, tk, Kp, Rp)
        vmem_limit_bytes = int(min(max(est * 5 // 4, 32 << 20), 64 << 20))

    scale = jnp.asarray([float(lora_alpha) / math.sqrt(float(lora_r))],
                        dtype=jnp.float32)

    def kernel(scale_ref, x_ref, bwT_ref, w1T_ref, w2T_ref,
               o_ref, acc_ref, h16_ref):
        # Grid: (i, j, k) = (M tiles, N tiles, K tiles), K innermost.
        # x_ref   : (tm, Kp) bf16  resident activation slab (per M tile)
        # bwT_ref : (tk, tn) bf16  streamed base-weight tile
        # w1T_ref : (Kp, Rp) bf16  fully resident LoRA down-proj weight
        # w2T_ref : (Rp, tn) bf16  LoRA up-proj tile (per N tile)
        # acc_ref : (tm, tn) f32   K accumulator (unused when nk == 1)
        # h16_ref : (tm, Rp) bf16  scaled LoRA down-projection (per M tile)
        j = pl.program_id(1)
        k = pl.program_id(2)

        # Hoisted LoRA down-projection: ONE matmul per M tile, reused for all
        # N tiles.  Correct only while j/k stay sequential ("arbitrary").
        @pl.when(jnp.logical_and(j == 0, k == 0))
        def _():
            h = jnp.dot(x_ref[...], w1T_ref[...],
                        preferred_element_type=jnp.float32)
            # Scale folded into the small (tm, Rp) intermediate; rounded to
            # bf16 once per M tile (matches the module's bf16 intermediate).
            h16_ref[...] = (scale_ref[0] * h).astype(h16_ref.dtype)

        k0 = pl.multiple_of(k * tk, 128)
        partial = jnp.dot(x_ref[:, pl.ds(k0, tk)], bwT_ref[...],
                          preferred_element_type=jnp.float32)

        if nk == 1:
            lora = jnp.dot(h16_ref[...], w2T_ref[...],
                           preferred_element_type=jnp.float32)
            o_ref[...] = (partial + lora).astype(o_ref.dtype)
        else:
            @pl.when(k == 0)
            def _():
                acc_ref[...] = partial          # direct store (no zero-init)

            @pl.when(jnp.logical_and(k > 0, k < nk - 1))
            def _():
                acc_ref[...] += partial

            @pl.when(k == nk - 1)
            def _():
                lora = jnp.dot(h16_ref[...], w2T_ref[...],
                               preferred_element_type=jnp.float32)
                o_ref[...] = (acc_ref[...] + partial + lora).astype(o_ref.dtype)

    out = pl.pallas_call(
        kernel,
        out_shape=jax.ShapeDtypeStruct((M, N), x.dtype),
        grid_spec=pltpu.PrefetchScalarGridSpec(
            num_scalar_prefetch=1,              # lora scale -> SMEM
            grid=grid,
            in_specs=[
                # x row-slab: resident across all (j, k) of an M tile.
                pl.BlockSpec((tm, Kp), lambda i, j, k, s: (i, 0)),
                # base_weight.T: streamed (k, j).
                pl.BlockSpec((tk, tn), lambda i, j, k, s: (k, j)),
                # W1.T: fully resident (never re-DMA'd).
                pl.BlockSpec((Kp, Rp), lambda i, j, k, s: (0, 0)),
                # W2.T: per N tile (small: Rp x tn).
                pl.BlockSpec((Rp, tn), lambda i, j, k, s: (0, j)),
            ],
            out_specs=pl.BlockSpec((tm, tn), lambda i, j, k, s: (i, j)),
            scratch_shapes=[
                pltpu.VMEM((tm, tn), jnp.float32),   # base-path accumulator
                pltpu.VMEM((tm, Rp), x.dtype),       # scaled bf16 LoRA h
            ],
        ),
        compiler_params=pltpu.CompilerParams(
            # i may shard across TensorCores; j/k MUST stay sequential
            # (K accumulator + hoisted-h reuse across N tiles).
            dimension_semantics=("parallel", "arbitrary", "arbitrary"),
            vmem_limit_bytes=vmem_limit_bytes),
    )(scale, x2d, bwT, w1T, w2T)

    return out.reshape(*orig_shape[:-1], N)


def _reference(x, base_weight, lora_w1, lora_w2, lora_alpha, lora_r):
    """Pure-JAX reference of the torch forward."""
    scale = float(lora_alpha) / math.sqrt(float(lora_r))
    xf = x.astype(jnp.float32)
    base = xf @ base_weight.T.astype(jnp.float32)
    h = (xf @ lora_w1.T.astype(jnp.float32)).astype(x.dtype).astype(jnp.float32)
    lora = h @ lora_w2.T.astype(jnp.float32)
    return (base + scale * lora).astype(x.dtype)


def _run_case(key, batch, seq, input_dim, output_dim, lora_r, lora_alpha,
              **fwd_kwargs):
    dtype = jnp.bfloat16
    k_x, k_bw, k_w1, k_w2 = jax.random.split(key, 4)

    # base_weight: xavier_uniform_ over (output_dim, input_dim)
    bound_bw = math.sqrt(6.0 / (input_dim + output_dim))
    base_weight = jax.random.uniform(
        k_bw, (output_dim, input_dim), minval=-bound_bw, maxval=bound_bw
    ).astype(dtype)

    # nn.Linear default init: U(-1/sqrt(fan_in), 1/sqrt(fan_in))
    b1 = 1.0 / math.sqrt(input_dim)
    lora_w1 = jax.random.uniform(
        k_w1, (lora_r, input_dim), minval=-b1, maxval=b1).astype(dtype)
    b2 = 1.0 / math.sqrt(lora_r)
    lora_w2 = jax.random.uniform(
        k_w2, (output_dim, lora_r), minval=-b2, maxval=b2).astype(dtype)

    x = jax.random.normal(k_x, (batch, seq, input_dim)).astype(dtype)

    prep_tk = fwd_kwargs.get("tk", 1024)
    bwT, w1T, w2T = prepare_lora_weights(base_weight, lora_w1, lora_w2,
                                         tk=prep_tk)
    out = lora_optimized_linear(x, bwT, w1T, w2T, lora_alpha, lora_r,
                                **fwd_kwargs)
    out = jax.block_until_ready(out)

    ref = _reference(x, base_weight, lora_w1, lora_w2, lora_alpha, lora_r)
    assert out.shape == (batch, seq, output_dim)
    assert out.dtype == dtype
    err = float(jnp.max(jnp.abs(out.astype(jnp.float32) -
                                ref.astype(jnp.float32))))
    denom = float(jnp.max(jnp.abs(ref.astype(jnp.float32)))) + 1e-6
    assert err / denom < 0.05, f"max abs err {err} (rel {err / denom})"


if __name__ == "__main__":
    base_key = jax.random.PRNGKey(0)

    # Small case matching the module's toy hyper-parameters (single K/N block).
    _run_case(jax.random.fold_in(base_key, 0),
              batch=2, seq=8, input_dim=32, output_dim=64,
              lora_r=8, lora_alpha=16)

    # Larger, non-aligned case exercising the full (M, N, K) grid, K
    # accumulation, hoisted-h reuse across N tiles, and masked M/N edge blocks
    # (grid = (3, 4, 3); M=300, N=840 ragged).
    _run_case(jax.random.fold_in(base_key, 1),
              batch=3, seq=100, input_dim=1536, output_dim=840,
              lora_r=16, lora_alpha=32,
              tm=128, tn=256, tk=512)

    print("KERNEL_OK")
</pallas_src>

<mosaic_0001>
module attributes {stable_mosaic.version = 11 : i64} {
  func.func @kernel(%arg0: i32, %arg1: i32, %arg2: i32, %arg3: memref<1xf32, #tpu.memory_space<smem>>, %arg4: memref<16x128xbf16, #tpu.memory_space<vmem>>, %arg5: memref<128x64xbf16, #tpu.memory_space<vmem>>, %arg6: memref<128x128xbf16, #tpu.memory_space<vmem>>, %arg7: memref<128x64xbf16, #tpu.memory_space<vmem>>, %arg8: memref<16x64xbf16, #tpu.memory_space<vmem>>, %arg9: memref<16x64xf32, #tpu.memory_space<vmem>>, %arg10: memref<16x128xbf16, #tpu.memory_space<vmem>>) attributes {dimension_semantics = [#tpu.dimension_semantics<parallel>, #tpu.dimension_semantics<arbitrary>, #tpu.dimension_semantics<arbitrary>], iteration_bounds = array<i64: 1, 1, 1>, scalar_prefetch = 1 : i64, scratch_operands = 2 : i64, tpu.core_type = #tpu.core_type<tc>, window_params = [{transform_indices = @transform_0, window_bounds = array<i64: 16, 128>}, {transform_indices = @transform_1, window_bounds = array<i64: 128, 64>}, {pipeline_mode = #tpu.pipeline_mode<synchronous>, transform_indices = @transform_2, window_bounds = array<i64: 128, 128>}, {transform_indices = @transform_3, window_bounds = array<i64: 128, 64>}, {transform_indices = @transform_4, window_bounds = array<i64: 16, 64>}]} {
    %c0_i32 = arith.constant 0 : i32
    %0 = arith.cmpi eq, %arg1, %c0_i32 : i32
    %c0_i32_0 = arith.constant 0 : i32
    %1 = arith.cmpi eq, %arg2, %c0_i32_0 : i32
    %2 = arith.andi %0, %1 : i1
    %3 = arith.extui %2 : i1 to i32
    %c0_i32_1 = arith.constant 0 : i32
    %4 = arith.cmpi ne, %3, %c0_i32_1 : i32
    scf.if %4 {
      %c0_11 = arith.constant 0 : index
      %c0_12 = arith.constant 0 : index
      %17 = vector.load %arg4[%c0_11, %c0_12] : memref<16x128xbf16, #tpu.memory_space<vmem>>, vector<16x128xbf16>
      %c0_13 = arith.constant 0 : index
      %c0_14 = arith.constant 0 : index
      %18 = vector.load %arg6[%c0_13, %c0_14] : memref<128x128xbf16, #tpu.memory_space<vmem>>, vector<128x128xbf16>
      %cst_15 = arith.constant dense<0.000000e+00> : vector<16x128xf32>
      %19 = tpu.matmul %17, %18, %cst_15 {dimension_numbers = #tpu.dot_dimension_numbers<[1], [0], [0], [1], [0, 0, 1, 1], [], []>} : vector<16x128xbf16>, vector<128x128xbf16>, vector<16x128xf32> -> vector<16x128xf32>
      %c0_16 = arith.constant 0 : index
      %20 = memref.load %arg3[%c0_16] : memref<1xf32, #tpu.memory_space<smem>>
      %21 = vector.broadcast %20 : f32 to vector<16x128xf32>
      %22 = arith.mulf %21, %19 : vector<16x128xf32>
      %23 = arith.truncf %22 : vector<16x128xf32> to vector<16x128xbf16>
      %c0_17 = arith.constant 0 : index
      %c0_18 = arith.constant 0 : index
      %24 = vector.load %arg10[%c0_17, %c0_18] : memref<16x128xbf16, #tpu.memory_space<vmem>>, vector<16x128xbf16>
      tpu.vector_store %arg10[%c0_17, %c0_18], %23 {strides = array<i32>} : memref<16x128xbf16, #tpu.memory_space<vmem>>, vector<16x128xbf16>,
    } else {
    }
    %c128_i32 = arith.constant 128 : i32
    %5 = arith.muli %arg2, %c128_i32 : i32
    %6 = tpu.assume_multiple %5, 128 : i32
    %c0 = arith.constant 0 : index
    %7 = arith.index_cast %6 : i32 to index
    %8 = vector.load %arg4[%c0, %7] : memref<16x128xbf16, #tpu.memory_space<vmem>>, vector<16x128xbf16>
    %c0_2 = arith.constant 0 : index
    %c0_3 = arith.constant 0 : index
    %9 = vector.load %arg5[%c0_2, %c0_3] : memref<128x64xbf16, #tpu.memory_space<vmem>>, vector<128x64xbf16>
    %cst = arith.constant dense<0.000000e+00> : vector<16x64xf32>
    %10 = tpu.matmul %8, %9, %cst {dimension_numbers = #tpu.dot_dimension_numbers<[1], [0], [0], [1], [0, 0, 1, 1], [], []>} : vector<16x128xbf16>, vector<128x64xbf16>, vector<16x64xf32> -> vector<16x64xf32>
    %c0_4 = arith.constant 0 : index
    %c0_5 = arith.constant 0 : index
    %11 = vector.load %arg10[%c0_4, %c0_5] : memref<16x128xbf16, #tpu.memory_space<vmem>>, vector<16x128xbf16>
    %c0_6 = arith.constant 0 : index
    %c0_7 = arith.constant 0 : index
    %12 = vector.load %arg7[%c0_6, %c0_7] : memref<128x64xbf16, #tpu.memory_space<vmem>>, vector<128x64xbf16>
    %cst_8 = arith.constant dense<0.000000e+00> : vector<16x64xf32>
    %13 = tpu.matmul %11, %12, %cst_8 {dimension_numbers = #tpu.dot_dimension_numbers<[1], [0], [0], [1], [0, 0, 1, 1], [], []>} : vector<16x128xbf16>, vector<128x64xbf16>, vector<16x64xf32> -> vector<16x64xf32>
    %14 = arith.addf %10, %13 : vector<16x64xf32>
    %15 = arith.truncf %14 : vector<16x64xf32> to vector<16x64xbf16>
    %c0_9 = arith.constant 0 : index
    %c0_10 = arith.constant 0 : index
    %16 = vector.load %arg8[%c0_9, %c0_10] : memref<16x64xbf16, #tpu.memory_space<vmem>>, vector<16x64xbf16>
    tpu.vector_store %arg8[%c0_9, %c0_10], %15 {strides = array<i32>} : memref<16x64xbf16, #tpu.memory_space<vmem>>, vector<16x64xbf16>,
    return
  }
  func.func @transform_0(%arg0: i32, %arg1: i32, %arg2: i32, %arg3: memref<1xf32, #tpu.memory_space<smem>>) -> (i32, i32) {
    %c0_i32 = arith.constant 0 : i32
    %c0_i32_0 = arith.constant 0 : i32
    return %arg0, %c0_i32 : i32, i32
  }
  func.func @transform_1(%arg0: i32, %arg1: i32, %arg2: i32, %arg3: memref<1xf32, #tpu.memory_space<smem>>) -> (i32, i32) {
    %c0_i32 = arith.constant 0 : i32
    return %arg2, %arg1 : i32, i32
  }
  func.func @transform_2(%arg0: i32, %arg1: i32, %arg2: i32, %arg3: memref<1xf32, #tpu.memory_space<smem>>) -> (i32, i32) {
    %c0_i32 = arith.constant 0 : i32
    %c0_i32_0 = arith.constant 0 : i32
    %c0_i32_1 = arith.constant 0 : i32
    return %c0_i32, %c0_i32_0 : i32, i32
  }
  func.func @transform_3(%arg0: i32, %arg1: i32, %arg2: i32, %arg3: memref<1xf32, #tpu.memory_space<smem>>) -> (i32, i32) {
    %c0_i32 = arith.constant 0 : i32
    %c0_i32_0 = arith.constant 0 : i32
    return %c0_i32, %arg1 : i32, i32
  }
  func.func @transform_4(%arg0: i32, %arg1: i32, %arg2: i32, %arg3: memref<1xf32, #tpu.memory_space<smem>>) -> (i32, i32) {
    %c0_i32 = arith.constant 0 : i32
    return %arg0, %arg1 : i32, i32
  }
}

</mosaic_0001>

<bundles_post_ra>
// kernel: tpu_custom_call.1
= control target key start
LH: loop header
LB: loop body
LE: loop exit
PB: predicated region body
PF: predicated region fallthrough
CT: control target
= control target key end

     0   :  { %v575_v1 = vmov 0.0   ;;  %vm576_vm0 = vmmov 0   ;;  %s733_s0 = inlined_call_operand.<no memory space> [shape: f32[1], index: 0, kind: input, shape index: {}]   ;;  %s734_s1 = inlined_call_operand.vmem [shape: bf16[16,128], index: 1, kind: input, shape index: {}]   ;;  %s735_s2 = inlined_call_operand.vmem [shape: bf16[128,64], index: 2, kind: input, shape index: {}]   ;;  %s736_s3 = inlined_call_operand.vmem [shape: bf16[128,128], index: 3, kind: input, shape index: {}]   ;;  %s737_s4 = inlined_call_operand.vmem [shape: bf16[128,64], index: 4, kind: input, shape index: {}]   ;;  %s738_s5 = inlined_call_operand.hbm [shape: bf16[16,64], index: 5, kind: output, shape index: {}]  }
   0x1   :  { %v525_v0 = vld [vmem:[%s736_s3] sm:$0xff]   ;;  %456 = vmatprep.subr.bf16.mxu0 %v575_v1  ;;  %476 = vmatprep.subr.bf16.mxu1 %v575_v1  ;;  %v526_v2 = vld [vmem:[%s736_s3 + $0x8] sm:$0xff]   ;;  %v527_v3 = vld [vmem:[%s736_s3 + $0x10] sm:$0xff]  }
   0x2   :  { %457 = vmatpush3.bf16.msra.mxu0 %v525_v0  ;;  %472 = vmatprep.mubr.msk.bf16.mxu0 %vm576_vm0, %v575_v1  ;;  %v534_v4 = vld [vmem:[%s737_s4] sm:$0xff]   ;;  %v528_v5 = vld [vmem:[%s736_s3 + $0x18] sm:$0xff]   ;;  %v535_v6 = vld [vmem:[%s737_s4 + $0x8] sm:$0xff]  }
   0x3   :  { %458 = vmatprep.subr.bf16.mxu0 %v575_v1  ;;  %492 = vmatprep.mubr.msk.bf16.mxu1 %vm576_vm0, %v575_v1  ;;  %v529_v7 = vld [vmem:[%s736_s3 + $0x20] sm:$0xff]   ;;  %v536_v8 = vld [vmem:[%s737_s4 + $0x10] sm:$0xff]   ;;  %v530_v9 = vld [vmem:[%s736_s3 + $0x28] sm:$0xff]  }
   0x4   :  { %477 = vmatpush3.bf16.msra.mxu1 %v534_v4  ;;  %v537_v10 = vld [vmem:[%s737_s4 + $0x18] sm:$0xff]   ;;  %v531_v11 = vld [vmem:[%s736_s3 + $0x30] sm:$0xff]  }
   0x5   :  { %478 = vmatprep.subr.bf16.mxu1 %v575_v1 }
   0x6   :  { %459 = vmatpush3.bf16.msra.mxu0 %v526_v2 }
   0x7   :  { %460 = vmatprep.subr.bf16.mxu0 %v575_v1 }
   0x8   :  { %479 = vmatpush3.bf16.msra.mxu1 %v535_v6 }
   0x9   :  { %480 = vmatprep.subr.bf16.mxu1 %v575_v1 }
   0xa   :  { %461 = vmatpush3.bf16.msra.mxu0 %v527_v3 }
   0xb   :  { %462 = vmatprep.subr.bf16.mxu0 %v575_v1 }
   0xc   :  { %481 = vmatpush3.bf16.msra.mxu1 %v536_v8 }
   0xd   :  { %482 = vmatprep.subr.bf16.mxu1 %v575_v1 }
   0xe   :  { %463 = vmatpush3.bf16.msra.mxu0 %v528_v5 }
   0xf   :  { %464 = vmatprep.subr.bf16.mxu0 %v575_v1 }
  0x12   :  { %465 = vmatpush3.bf16.msra.mxu0 %v529_v7 }
  0x13   :  { %466 = vmatprep.subr.bf16.mxu0 %v575_v1 }
  0x16   :  { %467 = vmatpush3.bf16.msra.mxu0 %v530_v9 }
  0x17   :  { %11 = vsyncpa [#allocation7], 0  ;;  %468 = vmatprep.subr.bf16.mxu0 %v575_v1  ;;  %483 = vmatpush3.bf16.msra.mxu1 %v537_v10  ;;  %v538_v12 = vld [vmem:[%s737_s4 + $0x20] sm:$0xff]   ;;  %v532_v13 = vld [vmem:[%s736_s3 + $0x38] sm:$0xff]   ;;  %v141_v19 = vstv %s733_s0  ;;  %s577_s19 = smov [#allocation6]   ;;  %vm378_vm1 = vcmask 519168  }
  0x18   :  { %484 = vmatprep.subr.bf16.mxu1 %v575_v1  ;;  %v539_v14 = vld [vmem:[%s737_s4 + $0x28] sm:$0xff]   ;;  %v533_v15 = vld [vmem:[%s734_s1] sm:$0xff]   ;;  %v540_v16 = vld [vmem:[%s737_s4 + $0x30] sm:$0xff]   ;;  %s386_s20 = sshll.u32 %s577_s19, 4  ;;  %s387_s20 = int_to_ptr.vmem [resolvable:$true] %s386_s20 }
  0x19   :  { %v541_v17 = vld [vmem:[%s737_s4 + $0x38] sm:$0xff]   ;;  %v542_v25 = vld [vmem:[%s735_s2] sm:$0xff]   ;;  %v543_v27 = vld [vmem:[%s735_s2 + $0x8] sm:$0xff]   ;;  %p556_p1 = scmp.lt.s32.totalorder %s387_s20, %s387_s20 }
  0x1a   :  { %469 = vmatpush3.bf16.msra.mxu0 %v531_v11  ;;  %v544_v28 = vld [vmem:[%s735_s2 + $0x10] sm:$0xff]   ;;  %v545_v29 = vld [vmem:[%s735_s2 + $0x18] sm:$0xff]   ;;  %v546_v30 = vld [vmem:[%s735_s2 + $0x20] sm:$0xff]  }
  0x1b   :  { %470 = vmatprep.subr.bf16.mxu0 %v575_v1  ;;  %485 = vmatpush3.bf16.msra.mxu1 %v538_v12  ;;  %v547_v31 = vld [vmem:[%s735_s2 + $0x28] sm:$0xff]   ;;  %v548_v32 = vld [vmem:[%s735_s2 + $0x30] sm:$0xff]   ;;  %v549_v33 = vld [vmem:[%s735_s2 + $0x38] sm:$0xff]   ;;  %s551_s2 = scalar_lea.vmem %s387_s20, 128 }
  0x1c   :  { %486 = vmatprep.subr.bf16.mxu1 %v575_v1  ;;  %v550_v34 = vld [vmem:[%s734_s1] sm:$0xff]   ;;  %p552_p0 = scmp.ne.s32.totalorder %s387_s20, %s551_s2  ;;  %p557_p2 = scmp.lt.s32.totalorder %s551_s2, %s551_s2 }
  0x1e   :  { %471 = vmatpush3.bf16.msra.mxu0 %v532_v13  ;;  %p558_p3 = por %p557_p2, %p556_p1 }
  0x1f   :  { %487 = vmatpush3.bf16.msra.mxu1 %v539_v14 }
  0x20   :  { %488 = vmatprep.subr.bf16.mxu1 %v575_v1  ;;  %p559_p4 = pnand %p558_p3, %p552_p0 }
  0x21   :  { %473 = vmatmul.mubr.bf16.vlgmr.msra.gmra.mrb[0].mxu0 %v533_v15 }
  0x23   :  { %489 = vmatpush3.bf16.msra.mxu1 %v540_v16 }
  0x24   :  { %490 = vmatprep.subr.bf16.mxu1 %v575_v1 }
  0x27   :  { %491 = vmatpush3.bf16.msra.mxu1 %v541_v17 }
  0x28   :  { %496 = vmatprep.subr.bf16.mxu1 %v575_v1 }
  0xf4   :  { %v133_v18 = vpop.f32.mrb[0].mxu0 }
  0xf5   :  { %v474_v20 = vpop.f32.mrb[1].mxu0  ;;  %v142_v22 = vmul.f32 %v141_v19, %v133_v18 }
  0xf6   :  { %v136_v21 = vpop.f32.mrb[2].mxu0 }
  0xf7   :  { %v143_v23 = vmul.f32 %v141_v19, %v136_v21  ;;  %v475_v24 = vpop.f32.mrb[3].mxu0 }
  0xf9   :  { %v144_v26 = vpack.c.bf16 %v143_v23, %v142_v22 }
  0xfb   :  { %493 = vmatmul.mubr.bf16.vlgmr.msra.gmra.mrb[0].mxu1 %v144_v26 }
  0xfc   :  { %497 = vmatpush3.bf16.msra.mxu1 %v542_v25  ;;  %512 = vmatprep.mubr.msk.bf16.mxu1 %vm576_vm0, %v575_v1 }
  0xfd   :  { %498 = vmatprep.subr.bf16.mxu1 %v575_v1 }
 0x100   :  { %499 = vmatpush3.bf16.msra.mxu1 %v543_v27 }
 0x101   :  { %500 = vmatprep.subr.bf16.mxu1 %v575_v1 }
 0x104   :  { %501 = vmatpush3.bf16.msra.mxu1 %v544_v28 }
 0x105   :  { %502 = vmatprep.subr.bf16.mxu1 %v575_v1 }
 0x108   :  { %503 = vmatpush3.bf16.msra.mxu1 %v545_v29 }
 0x109   :  { %504 = vmatprep.subr.bf16.mxu1 %v575_v1 }
 0x10c   :  { %505 = vmatpush3.bf16.msra.mxu1 %v546_v30 }
 0x10d   :  { %506 = vmatprep.subr.bf16.mxu1 %v575_v1 }
 0x110   :  { %507 = vmatpush3.bf16.msra.mxu1 %v547_v31 }
 0x111   :  { %508 = vmatprep.subr.bf16.mxu1 %v575_v1 }
 0x114   :  { %509 = vmatpush3.bf16.msra.mxu1 %v548_v32 }
 0x115   :  { %510 = vmatprep.subr.bf16.mxu1 %v575_v1 }
 0x118   :  { %511 = vmatpush3.bf16.msra.mxu1 %v549_v33 }
 0x11b   :  { %513 = vmatmul.mubr.bf16.vlgmr.msra.gmra.mrb[0].mxu1 %v550_v34 }
 0x1ee   :  { %v363_v35 = vpop.f32.mrb[0].mxu1 }
 0x1ef   :  { %v427_v36 = vpack.c.bf16 %v363_v35, %v363_v35  ;;  %v514_v37 = vpop.f32.mrb[1].mxu1 }
 0x1f0   :  { %v366_v38 = vpop.f32.mrb[2].mxu1 }
 0x1f1   :  { %379 = vst.msk [vmem:[#allocation6] sm:$0xf] %vm378_vm1, %v427_v36  ;;  %v428_v39 = vpack.c.bf16 %v366_v38, %v366_v38  ;;  %v515_v40 = vpop.f32.mrb[3].mxu1 }
 0x1f3   :  { %380 = vst.msk [vmem:[#allocation6 + $0x4] sm:$0xf] %vm378_vm1, %v428_v39 }
 0x1f4   :  { %562 = shalt.err (!%p559_p4)
}
 0x1f5   :  { %s563_s22 = scalar_lea.hbm %s738_s5, 128 }
 0x1f6   :  { %p564_p5 = scmp.ne.s32.totalorder %s738_s5, %s563_s22  ;;  %p567_p6 = scmp.lt.u32.totalorder %s563_s22, %s738_s5 }
 0x1f8   :  { %p569_p7 = pnand %p567_p6, %p564_p5 }
 0x1fa   :  { %572 = shalt.err (!%p569_p7)
}
 0x1fb   :  { %s578_s26 = smov 64   ;;  %s579_s27 = smov 4  }
 0x1fc   :  { %392 = dma.vmem_to_hbm [thread:$0]  %s387_s20, 128, %s738_s5, [#allocation7], %s578_s26, %s578_s26, %s579_s27  }
 0x1fd   :  { %573 = dma.done.wait [#allocation7], 128  }
 0x1fe   :  { %574 = vsyncadd [#allocation7], 4294967168 }
 0x1ff   :  { %396 = vsyncpa [#allocation7], 1 }

</bundles_post_ra>
